<compile_context>
chip_gen: v5e
topology: v5e:2x2
jax: 0.10.0
libtpu: 0.0.40
codegen_flags: <defaults>
</compile_context>

<pallas_src>
import functools

import jax
import jax.numpy as jnp
import numpy as np
from jax import lax
from jax.experimental import pallas as pl
from jax.experimental.pallas import tpu as pltpu


def mha_kernel(x_ref, wq_ref, bq_ref, wkv_ref, bkv_ref, wo_ref, bo_ref,
               o_ref, kv_ref, wv_ref, *,
               n_head, dim_per_head, q_tile, kv_chunk, n_kv_chunks, seq_len):
    """One (batch, query-tile) grid point.

    x_ref   : (1, T_pad, C)   bf16  full (padded) sequence of current batch elem
    wq_ref  : (C, C)          bf16
    bq_ref  : (1, C)          f32
    wkv_ref : (C, 2C)         bf16  [K | V] fused, K columns pre-scaled by qk_scale
    bkv_ref : (1, 2C)         f32   [0 | bv]
    wo_ref  : (C, C)          bf16
    bo_ref  : (1, C)          f32
    o_ref   : (1, TQ, C)      f32   output tile
    kv_ref  : (T_pad, 2C)     bf16  VMEM scratch: K/V of the whole sequence
    wv_ref  : (TQ, C)         bf16  VMEM scratch: concatenated head outputs
    """
    C = wq_ref.shape[0]
    d = dim_per_head
    t = pl.program_id(1)
    t_pad = kv_ref.shape[0]

    # (Re)build K (pre-scaled) and V for the whole sequence once per batch
    # element, in q_tile-row chunks to bound the transient f32 footprint.
    @pl.when(t == 0)
    def _():
        @pl.loop(0, n_kv_chunks)
        def _(c):
            r0 = pl.multiple_of(c * kv_chunk, kv_chunk)
            xs = x_ref[0, pl.ds(r0, kv_chunk), :]                     # (chunk, C) bf16
            kv = jnp.dot(xs, wkv_ref[...],
                         preferred_element_type=jnp.float32)          # (chunk, 2C) f32
            kv_ref[pl.ds(r0, kv_chunk), :] = (kv + bkv_ref[...]).astype(jnp.bfloat16)

    # Query projection for this tile only.
    row0 = pl.multiple_of(t * q_tile, q_tile)
    xq = x_ref[0, pl.ds(row0, q_tile), :]                              # (TQ, C) bf16
    q = jnp.dot(xq, wq_ref[...], preferred_element_type=jnp.float32) + bq_ref[...]
    q = q.astype(jnp.bfloat16)                                         # (TQ, C)

    # Per-head attention; head outputs are gathered in wv_ref so the output
    # projection is a single full-contraction matmul afterwards.
    for h in range(n_head):
        lo = h * d
        qh = q[:, lo:lo + d]                                           # (TQ, d) bf16
        kh = kv_ref[:, lo:lo + d]                                      # (T,  d) bf16
        vh = kv_ref[:, C + lo:C + lo + d]                              # (T,  d) bf16

        # scores = qh @ kh^T without materializing a transposed copy of kh.
        s = lax.dot_general(qh, kh,
                            dimension_numbers=(((1,), (1,)), ((), ())),
                            preferred_element_type=jnp.float32)        # (TQ, T_pad)
        if seq_len < t_pad:   # static branch: mask padded key positions
            key_idx = lax.broadcasted_iota(jnp.int32, s.shape, 1)
            s = jnp.where(key_idx < seq_len, s, jnp.float32(-1e30))

        # softmax over the key axis (matches torch .softmax(dim=1) on bkhq layout)
        m = jnp.max(s, axis=-1, keepdims=True)
        p = jnp.exp(s - m)                                             # unnormalized
        l = jnp.sum(p, axis=-1, keepdims=True)
        head = jnp.dot(p.astype(jnp.bfloat16), vh,
                       preferred_element_type=jnp.float32)             # (TQ, d)
        head = head * pl.reciprocal(l, approx=True)                    # normalize small tensor
        wv_ref[:, lo:lo + d] = head.astype(jnp.bfloat16)

    # Single K=C output projection over the concatenated heads.
    o = jnp.dot(wv_ref[...], wo_ref[...], preferred_element_type=jnp.float32)
    o_ref[0] = (o + bo_ref[...]).astype(o_ref.dtype)


def _hw_config():
    """Pick (q_tile, vmem_limit_bytes) per chip generation."""
    cap = 0
    try:
        cap = int(pltpu.get_tpu_info().vmem_capacity_bytes)
    except Exception:
        cap = 0
    if cap >= 100 * 1024 * 1024:
        # v5e / v6e class: 128 MiB VMEM -> bigger query tile, higher scoped limit.
        q_tile, limit = 256, 96 * 1024 * 1024
    else:
        # v7x class (64 MiB per TC) or unknown: conservative.
        q_tile, limit = 128, 52 * 1024 * 1024
    if cap:
        limit = min(limit, int(cap * 0.85))
    return q_tile, limit


def multi_head_attention(x, params, *, n_head, q_tile=None, vmem_limit_bytes=None):
    """x: (B, T, C) float32.  params: dict of PyTorch-convention weights."""
    B, T, C = x.shape
    assert C % n_head == 0
    d = C // n_head
    qk_scale = float(d) ** -0.5

    hw_tile, hw_limit = _hw_config()
    if q_tile is None:
        q_tile = hw_tile
    if vmem_limit_bytes is None:
        vmem_limit_bytes = hw_limit

    if T <= q_tile:
        q_tile = T
        T_pad = T
    else:
        T_pad = int(pl.cdiv(T, q_tile)) * q_tile
    n_qt = T_pad // q_tile

    # bf16 activations into the kernel (f32 accumulation inside); pad the
    # sequence axis so it divides evenly into query tiles.
    x_bf = x.astype(jnp.bfloat16)
    if T_pad != T:
        x_bf = jnp.pad(x_bf, ((0, 0), (0, T_pad - T), (0, 0)))

    # PyTorch Linear stores W as (out_features, in_features); transpose once so
    # the kernel computes y = x @ W.  Fold the qk scale into the key weights,
    # fuse K/V into one (C, 2C) matrix, cast weights to bf16.
    wq = params["wq"].T.astype(jnp.bfloat16)
    wkv = jnp.concatenate([params["wk"].T * qk_scale, params["wv"].T],
                          axis=1).astype(jnp.bfloat16)                 # (C, 2C)
    wo = params["wo"].T.astype(jnp.bfloat16)
    bq = params["bq"].reshape(1, C).astype(jnp.float32)
    bkv = jnp.concatenate([jnp.zeros((C,), jnp.float32),
                           params["bv"].astype(jnp.float32)]).reshape(1, 2 * C)
    bo = params["bo"].reshape(1, C).astype(jnp.float32)

    kernel = functools.partial(
        mha_kernel, n_head=n_head, dim_per_head=d, q_tile=q_tile,
        kv_chunk=q_tile, n_kv_chunks=n_qt, seq_len=T)

    const = lambda b, t: (0, 0)

    def _const_spec(shape):
        # Grid-constant blocks: single-buffer them (double-buffering would only
        # duplicate ~13 MB of bf16 weights at Whisper sizes).
        try:
            return pl.BlockSpec(shape, const, pipeline_mode=pl.Buffered(1))
        except Exception:
            return pl.BlockSpec(shape, const)

    # Advisory cost estimate (~32 GF/batch at Whisper shapes).
    flops = B * (8 * T_pad * C * C + 4 * T_pad * T_pad * C)
    transcendentals = B * n_head * T_pad * T_pad
    bytes_accessed = (B * T_pad * C * 2          # x (bf16)
                      + 8 * C * C                # bf16 weights (wq + wkv + wo)
                      + B * T_pad * C * 4)       # f32 output

    out = pl.pallas_call(
        kernel,
        out_shape=jax.ShapeDtypeStruct((B, T_pad, C), x.dtype),
        grid_spec=pltpu.PrefetchScalarGridSpec(
            num_scalar_prefetch=0,
            grid=(B, n_qt),
            in_specs=[
                # Full (padded) sequence per batch element; constant block index
                # over the query-tile axis, so it is only re-DMA'd when b changes.
                pl.BlockSpec((1, T_pad, C), lambda b, t: (b, 0, 0)),   # x (bf16)
                _const_spec((C, C)),                                   # wq  (bf16)
                _const_spec((1, C)),                                   # bq
                _const_spec((C, 2 * C)),                               # wkv (bf16)
                _const_spec((1, 2 * C)),                               # bkv
                _const_spec((C, C)),                                   # wo  (bf16)
                _const_spec((1, C)),                                   # bo
            ],
            out_specs=pl.BlockSpec((1, q_tile, C), lambda b, t: (b, t, 0)),
            scratch_shapes=[pltpu.VMEM((T_pad, 2 * C), jnp.bfloat16),  # K/V cache
                            pltpu.VMEM((q_tile, C), jnp.bfloat16)],    # head outputs
        ),
        compiler_params=pltpu.CompilerParams(
            # K/V scratch carries state across the query-tile axis -> "arbitrary".
            dimension_semantics=("parallel", "arbitrary"),
            vmem_limit_bytes=vmem_limit_bytes),
        cost_estimate=pl.CostEstimate(flops=flops,
                                      transcendentals=transcendentals,
                                      bytes_accessed=bytes_accessed),
    )(x_bf, wq, bq, wkv, bkv, wo, bo)

    if T_pad != T:
        out = out[:, :T, :]
    return out


def reference_mha(x, params, *, n_head):
    """Pure-JAX f32 reference mirroring the PyTorch forward exactly."""
    B, T, C = x.shape
    d = C // n_head
    scale = float(d) ** -0.5
    q = x @ params["wq"].T + params["bq"]
    k = (x @ params["wk"].T) * scale
    v = x @ params["wv"].T + params["bv"]
    qh = q.reshape(B, T, n_head, d)
    kh = k.reshape(B, T, n_head, d)
    vh = v.reshape(B, T, n_head, d)
    s = jnp.einsum("bqhd,bkhd->bhqk", qh, kh)
    p = jax.nn.softmax(s, axis=-1)
    o = jnp.einsum("bhqk,bkhd->bqhd", p, vh).reshape(B, T, C)
    return o @ params["wo"].T + params["bo"]


def _make_inputs(B, T, C, key):
    ks = jax.random.split(key, 8)
    params = {
        "wq": 0.05 * jax.random.normal(ks[0], (C, C), jnp.float32),
        "bq": 0.05 * jax.random.normal(ks[1], (C,), jnp.float32),
        "wk": 0.05 * jax.random.normal(ks[2], (C, C), jnp.float32),
        "wv": 0.05 * jax.random.normal(ks[3], (C, C), jnp.float32),
        "bv": 0.05 * jax.random.normal(ks[4], (C,), jnp.float32),
        "wo": 0.05 * jax.random.normal(ks[5], (C, C), jnp.float32),
        "bo": 0.05 * jax.random.normal(ks[6], (C,), jnp.float32),
    }
    x = jax.random.normal(ks[7], (B, T, C), jnp.float32)
    return x, params


if __name__ == "__main__":
    key0, key1 = jax.random.split(jax.random.PRNGKey(0))

    # Test 1: tiny shapes, single query tile (no padding).
    B, T, C, n_head = 2, 8, 32, 4
    x, params = _make_inputs(B, T, C, key0)
    out = jax.block_until_ready(multi_head_attention(x, params, n_head=n_head))
    ref = jax.block_until_ready(reference_mha(x, params, n_head=n_head))
    # bf16 weights/activations inside the kernel (f32 accumulation) -> loosened
    # tolerance vs. the pure-f32 reference.
    np.testing.assert_allclose(np.asarray(out), np.asarray(ref), rtol=2e-2, atol=2e-2)

    # Test 2: exercises the padded / multi-tile / key-mask path
    # (T=20, q_tile=8 -> T_pad=24, 3 query tiles, masked tail keys).
    x2, params2 = _make_inputs(1, 20, C, key1)
    out2 = jax.block_until_ready(
        multi_head_attention(x2, params2, n_head=n_head, q_tile=8))
    ref2 = jax.block_until_ready(reference_mha(x2, params2, n_head=n_head))
    np.testing.assert_allclose(np.asarray(out2), np.asarray(ref2), rtol=2e-2, atol=2e-2)

    print("KERNEL_OK")
</pallas_src>

<mosaic_0001>
module attributes {stable_mosaic.version = 11 : i64} {
  func.func @mha_kernel(%arg0: i32, %arg1: i32, %arg2: memref<1x8x32xbf16, #tpu.memory_space<vmem>>, %arg3: memref<32x32xbf16, #tpu.memory_space<vmem>>, %arg4: memref<1x32xf32, #tpu.memory_space<vmem>>, %arg5: memref<32x64xbf16, #tpu.memory_space<vmem>>, %arg6: memref<1x64xf32, #tpu.memory_space<vmem>>, %arg7: memref<32x32xbf16, #tpu.memory_space<vmem>>, %arg8: memref<1x32xf32, #tpu.memory_space<vmem>>, %arg9: memref<1x8x32xf32, #tpu.memory_space<vmem>>, %arg10: memref<8x64xbf16, #tpu.memory_space<vmem>>, %arg11: memref<8x32xbf16, #tpu.memory_space<vmem>>) attributes {dimension_semantics = [#tpu.dimension_semantics<parallel>, #tpu.dimension_semantics<arbitrary>], iteration_bounds = array<i64: 2, 1>, scalar_prefetch = 0 : i64, scratch_operands = 2 : i64, tpu.core_type = #tpu.core_type<tc>, window_params = [{transform_indices = @transform_0, window_bounds = array<i64: 1, 8, 32>}, {pipeline_mode = #tpu.pipeline_mode<synchronous>, transform_indices = @transform_1, window_bounds = array<i64: 32, 32>}, {pipeline_mode = #tpu.pipeline_mode<synchronous>, transform_indices = @transform_2, window_bounds = array<i64: 1, 32>}, {pipeline_mode = #tpu.pipeline_mode<synchronous>, transform_indices = @transform_3, window_bounds = array<i64: 32, 64>}, {pipeline_mode = #tpu.pipeline_mode<synchronous>, transform_indices = @transform_4, window_bounds = array<i64: 1, 64>}, {pipeline_mode = #tpu.pipeline_mode<synchronous>, transform_indices = @transform_5, window_bounds = array<i64: 32, 32>}, {pipeline_mode = #tpu.pipeline_mode<synchronous>, transform_indices = @transform_6, window_bounds = array<i64: 1, 32>}, {transform_indices = @transform_7, window_bounds = array<i64: 1, 8, 32>}]} {
    %c0_i32 = arith.constant 0 : i32
    %0 = arith.cmpi eq, %arg1, %c0_i32 : i32
    %1 = arith.extui %0 : i1 to i32
    %c0_i32_0 = arith.constant 0 : i32
    %2 = arith.cmpi ne, %1, %c0_i32_0 : i32
    scf.if %2 {
      %c0_i32_49 = arith.constant 0 : i32
      %c1_i32 = arith.constant 1 : i32
      %95 = arith.muli %c0_i32_49, %c1_i32 : i32
      %c0_i32_50 = arith.constant 0 : i32
      %96 = arith.addi %c0_i32_50, %95 : i32
      %c8_i32_51 = arith.constant 8 : i32
      %97 = arith.muli %96, %c8_i32_51 : i32
      %98 = tpu.assume_multiple %97, 8 : i32
      %c0_52 = arith.constant 0 : index
      %99 = arith.index_cast %98 : i32 to index
      %c0_53 = arith.constant 0 : index
      %100 = vector.load %arg2[%c0_52, %99, %c0_53] : memref<1x8x32xbf16, #tpu.memory_space<vmem>>, vector<1x8x32xbf16>
      %101 = vector.shape_cast %100 : vector<1x8x32xbf16> to vector<8x32xbf16>
      %c0_54 = arith.constant 0 : index
      %c0_55 = arith.constant 0 : index
      %102 = vector.load %arg5[%c0_54, %c0_55] : memref<32x64xbf16, #tpu.memory_space<vmem>>, vector<32x64xbf16>
      %cst_56 = arith.constant dense<0.000000e+00> : vector<8x64xf32>
      %103 = tpu.matmul %101, %102, %cst_56 {dimension_numbers = #tpu.dot_dimension_numbers<[1], [0], [0], [1], [0, 0, 1, 1], [], []>} : vector<8x32xbf16>, vector<32x64xbf16>, vector<8x64xf32> -> vector<8x64xf32>
      %c0_57 = arith.constant 0 : index
      %c0_58 = arith.constant 0 : index
      %104 = vector.load %arg6[%c0_57, %c0_58] : memref<1x64xf32, #tpu.memory_space<vmem>>, vector<1x64xf32>
      %105 = vector.broadcast %104 : vector<1x64xf32> to vector<8x64xf32>
      %106 = arith.addf %103, %105 : vector<8x64xf32>
      %107 = arith.truncf %106 : vector<8x64xf32> to vector<8x64xbf16>
      %108 = arith.index_cast %98 : i32 to index
      %c0_59 = arith.constant 0 : index
      %109 = vector.load %arg10[%108, %c0_59] : memref<8x64xbf16, #tpu.memory_space<vmem>>, vector<8x64xbf16>
      tpu.vector_store %arg10[%108, %c0_59], %107 {strides = array<i32>} : memref<8x64xbf16, #tpu.memory_space<vmem>>, vector<8x64xbf16>,
      %c1_i32_60 = arith.constant 1 : i32
    } else {
    }
    %c8_i32 = arith.constant 8 : i32
    %3 = arith.muli %arg1, %c8_i32 : i32
    %4 = tpu.assume_multiple %3, 8 : i32
    %c0 = arith.constant 0 : index
    %5 = arith.index_cast %4 : i32 to index
    %c0_1 = arith.constant 0 : index
    %6 = vector.load %arg2[%c0, %5, %c0_1] : memref<1x8x32xbf16, #tpu.memory_space<vmem>>, vector<1x8x32xbf16>
    %7 = vector.shape_cast %6 : vector<1x8x32xbf16> to vector<8x32xbf16>
    %c0_2 = arith.constant 0 : index
    %c0_3 = arith.constant 0 : index
    %8 = vector.load %arg3[%c0_2, %c0_3] : memref<32x32xbf16, #tpu.memory_space<vmem>>, vector<32x32xbf16>
    %cst = arith.constant dense<0.000000e+00> : vector<8x32xf32>
    %9 = tpu.matmul %7, %8, %cst {dimension_numbers = #tpu.dot_dimension_numbers<[1], [0], [0], [1], [0, 0, 1, 1], [], []>} : vector<8x32xbf16>, vector<32x32xbf16>, vector<8x32xf32> -> vector<8x32xf32>
    %c0_4 = arith.constant 0 : index
    %c0_5 = arith.constant 0 : index
    %10 = vector.load %arg4[%c0_4, %c0_5] : memref<1x32xf32, #tpu.memory_space<vmem>>, vector<1x32xf32>
    %11 = vector.broadcast %10 : vector<1x32xf32> to vector<8x32xf32>
    %12 = arith.addf %9, %11 : vector<8x32xf32>
    %13 = arith.truncf %12 : vector<8x32xf32> to vector<8x32xbf16>
    %14 = vector.extract_strided_slice %13 {offsets = [0, 0], sizes = [8, 8], strides = [1, 1]} : vector<8x32xbf16> to vector<8x8xbf16>
    %c0_6 = arith.constant 0 : index
    %c0_7 = arith.constant 0 : index
    %15 = vector.load %arg10[%c0_6, %c0_7] : memref<8x64xbf16, #tpu.memory_space<vmem>>, vector<8x8xbf16>
    %c0_8 = arith.constant 0 : index
    %c32 = arith.constant 32 : index
    %16 = vector.load %arg10[%c0_8, %c32] : memref<8x64xbf16, #tpu.memory_space<vmem>>, vector<8x8xbf16>
    %cst_9 = arith.constant dense<0.000000e+00> : vector<8x8xf32>
    %17 = tpu.matmul %14, %15, %cst_9 {dimension_numbers = #tpu.dot_dimension_numbers<[1], [1], [0], [0], [0, 0, 1, 0], [], []>} : vector<8x8xbf16>, vector<8x8xbf16>, vector<8x8xf32> -> vector<8x8xf32>
    %cst_10 = arith.constant dense<0xFF800000> : vector<8xf32>
    %18 = vector.multi_reduction <maximumf>, %17, %cst_10 [1] : vector<8x8xf32> to vector<8xf32>
    %19 = vector.shape_cast %18 : vector<8xf32> to vector<8x1xf32>
    %20 = vector.broadcast %19 : vector<8x1xf32> to vector<8x8xf32>
    %21 = arith.subf %17, %20 : vector<8x8xf32>
    %22 = math.exp %21 : vector<8x8xf32>
    %cst_11 = arith.constant dense<0.000000e+00> : vector<8xf32>
    %23 = vector.multi_reduction <add>, %22, %cst_11 [1] : vector<8x8xf32> to vector<8xf32>
    %24 = vector.shape_cast %23 : vector<8xf32> to vector<8x1xf32>
    %25 = arith.truncf %22 : vector<8x8xf32> to vector<8x8xbf16>
    %cst_12 = arith.constant dense<0.000000e+00> : vector<8x8xf32>
    %26 = tpu.matmul %25, %16, %cst_12 {dimension_numbers = #tpu.dot_dimension_numbers<[1], [0], [0], [1], [0, 0, 1, 1], [], []>} : vector<8x8xbf16>, vector<8x8xbf16>, vector<8x8xf32> -> vector<8x8xf32>
    %27 = tpu.reciprocal %24 {approx = true} : vector<8x1xf32> -> vector<8x1xf32>
    %28 = vector.broadcast %27 : vector<8x1xf32> to vector<8x8xf32>
    %29 = arith.mulf %26, %28 : vector<8x8xf32>
    %30 = arith.truncf %29 : vector<8x8xf32> to vector<8x8xbf16>
    %c0_13 = arith.constant 0 : index
    %c0_14 = arith.constant 0 : index
    %31 = vector.load %arg11[%c0_13, %c0_14] : memref<8x32xbf16, #tpu.memory_space<vmem>>, vector<8x8xbf16>
    tpu.vector_store %arg11[%c0_13, %c0_14], %30 {strides = array<i32>} : memref<8x32xbf16, #tpu.memory_space<vmem>>, vector<8x8xbf16>,
    %32 = vector.extract_strided_slice %13 {offsets = [0, 8], sizes = [8, 8], strides = [1, 1]} : vector<8x32xbf16> to vector<8x8xbf16>
    %c0_15 = arith.constant 0 : index
    %c8 = arith.constant 8 : index
    %33 = vector.load %arg10[%c0_15, %c8] : memref<8x64xbf16, #tpu.memory_space<vmem>>, vector<8x8xbf16>
    %c0_16 = arith.constant 0 : index
    %c40 = arith.constant 40 : index
    %34 = vector.load %arg10[%c0_16, %c40] : memref<8x64xbf16, #tpu.memory_space<vmem>>, vector<8x8xbf16>
    %cst_17 = arith.constant dense<0.000000e+00> : vector<8x8xf32>
    %35 = tpu.matmul %32, %33, %cst_17 {dimension_numbers = #tpu.dot_dimension_numbers<[1], [1], [0], [0], [0, 0, 1, 0], [], []>} : vector<8x8xbf16>, vector<8x8xbf16>, vector<8x8xf32> -> vector<8x8xf32>
    %cst_18 = arith.constant dense<0xFF800000> : vector<8xf32>
    %36 = vector.multi_reduction <maximumf>, %35, %cst_18 [1] : vector<8x8xf32> to vector<8xf32>
    %37 = vector.shape_cast %36 : vector<8xf32> to vector<8x1xf32>
    %38 = vector.broadcast %37 : vector<8x1xf32> to vector<8x8xf32>
    %39 = arith.subf %35, %38 : vector<8x8xf32>
    %40 = math.exp %39 : vector<8x8xf32>
    %cst_19 = arith.constant dense<0.000000e+00> : vector<8xf32>
    %41 = vector.multi_reduction <add>, %40, %cst_19 [1] : vector<8x8xf32> to vector<8xf32>
    %42 = vector.shape_cast %41 : vector<8xf32> to vector<8x1xf32>
    %43 = arith.truncf %40 : vector<8x8xf32> to vector<8x8xbf16>
    %cst_20 = arith.constant dense<0.000000e+00> : vector<8x8xf32>
    %44 = tpu.matmul %43, %34, %cst_20 {dimension_numbers = #tpu.dot_dimension_numbers<[1], [0], [0], [1], [0, 0, 1, 1], [], []>} : vector<8x8xbf16>, vector<8x8xbf16>, vector<8x8xf32> -> vector<8x8xf32>
    %45 = tpu.reciprocal %42 {approx = true} : vector<8x1xf32> -> vector<8x1xf32>
    %46 = vector.broadcast %45 : vector<8x1xf32> to vector<8x8xf32>
    %47 = arith.mulf %44, %46 : vector<8x8xf32>
    %48 = arith.truncf %47 : vector<8x8xf32> to vector<8x8xbf16>
    %c0_21 = arith.constant 0 : index
    %c8_22 = arith.constant 8 : index
    %49 = vector.load %arg11[%c0_21, %c8_22] : memref<8x32xbf16, #tpu.memory_space<vmem>>, vector<8x8xbf16>
    tpu.vector_store %arg11[%c0_21, %c8_22], %48 {strides = array<i32>} : memref<8x32xbf16, #tpu.memory_space<vmem>>, vector<8x8xbf16>,
    %50 = vector.extract_strided_slice %13 {offsets = [0, 16], sizes = [8, 8], strides = [1, 1]} : vector<8x32xbf16> to vector<8x8xbf16>
    %c0_23 = arith.constant 0 : index
    %c16 = arith.constant 16 : index
    %51 = vector.load %arg10[%c0_23, %c16] : memref<8x64xbf16, #tpu.memory_space<vmem>>, vector<8x8xbf16>
    %c0_24 = arith.constant 0 : index
    %c48 = arith.constant 48 : index
    %52 = vector.load %arg10[%c0_24, %c48] : memref<8x64xbf16, #tpu.memory_space<vmem>>, vector<8x8xbf16>
    %cst_25 = arith.constant dense<0.000000e+00> : vector<8x8xf32>
    %53 = tpu.matmul %50, %51, %cst_25 {dimension_numbers = #tpu.dot_dimension_numbers<[1], [1], [0], [0], [0, 0, 1, 0], [], []>} : vector<8x8xbf16>, vector<8x8xbf16>, vector<8x8xf32> -> vector<8x8xf32>
    %cst_26 = arith.constant dense<0xFF800000> : vector<8xf32>
    %54 = vector.multi_reduction <maximumf>, %53, %cst_26 [1] : vector<8x8xf32> to vector<8xf32>
    %55 = vector.shape_cast %54 : vector<8xf32> to vector<8x1xf32>
    %56 = vector.broadcast %55 : vector<8x1xf32> to vector<8x8xf32>
    %57 = arith.subf %53, %56 : vector<8x8xf32>
    %58 = math.exp %57 : vector<8x8xf32>
    %cst_27 = arith.constant dense<0.000000e+00> : vector<8xf32>
    %59 = vector.multi_reduction <add>, %58, %cst_27 [1] : vector<8x8xf32> to vector<8xf32>
    %60 = vector.shape_cast %59 : vector<8xf32> to vector<8x1xf32>
    %61 = arith.truncf %58 : vector<8x8xf32> to vector<8x8xbf16>
    %cst_28 = arith.constant dense<0.000000e+00> : vector<8x8xf32>
    %62 = tpu.matmul %61, %52, %cst_28 {dimension_numbers = #tpu.dot_dimension_numbers<[1], [0], [0], [1], [0, 0, 1, 1], [], []>} : vector<8x8xbf16>, vector<8x8xbf16>, vector<8x8xf32> -> vector<8x8xf32>
    %63 = tpu.reciprocal %60 {approx = true} : vector<8x1xf32> -> vector<8x1xf32>
    %64 = vector.broadcast %63 : vector<8x1xf32> to vector<8x8xf32>
    %65 = arith.mulf %62, %64 : vector<8x8xf32>
    %66 = arith.truncf %65 : vector<8x8xf32> to vector<8x8xbf16>
    %c0_29 = arith.constant 0 : index
    %c16_30 = arith.constant 16 : index
    %67 = vector.load %arg11[%c0_29, %c16_30] : memref<8x32xbf16, #tpu.memory_space<vmem>>, vector<8x8xbf16>
    tpu.vector_store %arg11[%c0_29, %c16_30], %66 {strides = array<i32>} : memref<8x32xbf16, #tpu.memory_space<vmem>>, vector<8x8xbf16>,
    %68 = vector.extract_strided_slice %13 {offsets = [0, 24], sizes = [8, 8], strides = [1, 1]} : vector<8x32xbf16> to vector<8x8xbf16>
    %c0_31 = arith.constant 0 : index
    %c24 = arith.constant 24 : index
    %69 = vector.load %arg10[%c0_31, %c24] : memref<8x64xbf16, #tpu.memory_space<vmem>>, vector<8x8xbf16>
    %c0_32 = arith.constant 0 : index
    %c56 = arith.constant 56 : index
    %70 = vector.load %arg10[%c0_32, %c56] : memref<8x64xbf16, #tpu.memory_space<vmem>>, vector<8x8xbf16>
    %cst_33 = arith.constant dense<0.000000e+00> : vector<8x8xf32>
    %71 = tpu.matmul %68, %69, %cst_33 {dimension_numbers = #tpu.dot_dimension_numbers<[1], [1], [0], [0], [0, 0, 1, 0], [], []>} : vector<8x8xbf16>, vector<8x8xbf16>, vector<8x8xf32> -> vector<8x8xf32>
    %cst_34 = arith.constant dense<0xFF800000> : vector<8xf32>
    %72 = vector.multi_reduction <maximumf>, %71, %cst_34 [1] : vector<8x8xf32> to vector<8xf32>
    %73 = vector.shape_cast %72 : vector<8xf32> to vector<8x1xf32>
    %74 = vector.broadcast %73 : vector<8x1xf32> to vector<8x8xf32>
    %75 = arith.subf %71, %74 : vector<8x8xf32>
    %76 = math.exp %75 : vector<8x8xf32>
    %cst_35 = arith.constant dense<0.000000e+00> : vector<8xf32>
    %77 = vector.multi_reduction <add>, %76, %cst_35 [1] : vector<8x8xf32> to vector<8xf32>
    %78 = vector.shape_cast %77 : vector<8xf32> to vector<8x1xf32>
    %79 = arith.truncf %76 : vector<8x8xf32> to vector<8x8xbf16>
    %cst_36 = arith.constant dense<0.000000e+00> : vector<8x8xf32>
    %80 = tpu.matmul %79, %70, %cst_36 {dimension_numbers = #tpu.dot_dimension_numbers<[1], [0], [0], [1], [0, 0, 1, 1], [], []>} : vector<8x8xbf16>, vector<8x8xbf16>, vector<8x8xf32> -> vector<8x8xf32>
    %81 = tpu.reciprocal %78 {approx = true} : vector<8x1xf32> -> vector<8x1xf32>
    %82 = vector.broadcast %81 : vector<8x1xf32> to vector<8x8xf32>
    %83 = arith.mulf %80, %82 : vector<8x8xf32>
    %84 = arith.truncf %83 : vector<8x8xf32> to vector<8x8xbf16>
    %c0_37 = arith.constant 0 : index
    %c24_38 = arith.constant 24 : index
    %85 = vector.load %arg11[%c0_37, %c24_38] : memref<8x32xbf16, #tpu.memory_space<vmem>>, vector<8x8xbf16>
    tpu.vector_store %arg11[%c0_37, %c24_38], %84 {strides = array<i32>} : memref<8x32xbf16, #tpu.memory_space<vmem>>, vector<8x8xbf16>,
    %c0_39 = arith.constant 0 : index
    %c0_40 = arith.constant 0 : index
    %86 = vector.load %arg11[%c0_39, %c0_40] : memref<8x32xbf16, #tpu.memory_space<vmem>>, vector<8x32xbf16>
    %c0_41 = arith.constant 0 : index
    %c0_42 = arith.constant 0 : index
    %87 = vector.load %arg7[%c0_41, %c0_42] : memref<32x32xbf16, #tpu.memory_space<vmem>>, vector<32x32xbf16>
    %cst_43 = arith.constant dense<0.000000e+00> : vector<8x32xf32>
    %88 = tpu.matmul %86, %87, %cst_43 {dimension_numbers = #tpu.dot_dimension_numbers<[1], [0], [0], [1], [0, 0, 1, 1], [], []>} : vector<8x32xbf16>, vector<32x32xbf16>, vector<8x32xf32> -> vector<8x32xf32>
    %c0_44 = arith.constant 0 : index
    %c0_45 = arith.constant 0 : index
    %89 = vector.load %arg8[%c0_44, %c0_45] : memref<1x32xf32, #tpu.memory_space<vmem>>, vector<1x32xf32>
    %90 = vector.broadcast %89 : vector<1x32xf32> to vector<8x32xf32>
    %91 = arith.addf %88, %90 : vector<8x32xf32>
    %c0_46 = arith.constant 0 : index
    %c0_47 = arith.constant 0 : index
    %c0_48 = arith.constant 0 : index
    %92 = vector.load %arg9[%c0_46, %c0_47, %c0_48] : memref<1x8x32xf32, #tpu.memory_space<vmem>>, vector<1x8x32xf32>
    %93 = vector.shape_cast %92 : vector<1x8x32xf32> to vector<8x32xf32>
    %94 = vector.shape_cast %91 : vector<8x32xf32> to vector<1x8x32xf32>
    tpu.vector_store %arg9[%c0_46, %c0_47, %c0_48], %94 {strides = array<i32>} : memref<1x8x32xf32, #tpu.memory_space<vmem>>, vector<1x8x32xf32>,
    return
  }
  func.func @transform_0(%arg0: i32, %arg1: i32) -> (i32, i32, i32) {
    %c0_i32 = arith.constant 0 : i32
    %c0_i32_0 = arith.constant 0 : i32
    %c0_i32_1 = arith.constant 0 : i32
    return %arg0, %c0_i32, %c0_i32_0 : i32, i32, i32
  }
  func.func @transform_1(%arg0: i32, %arg1: i32) -> (i32, i32) {
    %c0_i32 = arith.constant 0 : i32
    %c0_i32_0 = arith.constant 0 : i32
    %c0_i32_1 = arith.constant 0 : i32
    return %c0_i32, %c0_i32_0 : i32, i32
  }
  func.func @transform_2(%arg0: i32, %arg1: i32) -> (i32, i32) {
    %c0_i32 = arith.constant 0 : i32
    %c0_i32_0 = arith.constant 0 : i32
    %c0_i32_1 = arith.constant 0 : i32
    return %c0_i32, %c0_i32_0 : i32, i32
  }
  func.func @transform_3(%arg0: i32, %arg1: i32) -> (i32, i32) {
    %c0_i32 = arith.constant 0 : i32
    %c0_i32_0 = arith.constant 0 : i32
    %c0_i32_1 = arith.constant 0 : i32
    return %c0_i32, %c0_i32_0 : i32, i32
  }
  func.func @transform_4(%arg0: i32, %arg1: i32) -> (i32, i32) {
    %c0_i32 = arith.constant 0 : i32
    %c0_i32_0 = arith.constant 0 : i32
    %c0_i32_1 = arith.constant 0 : i32
    return %c0_i32, %c0_i32_0 : i32, i32
  }
  func.func @transform_5(%arg0: i32, %arg1: i32) -> (i32, i32) {
    %c0_i32 = arith.constant 0 : i32
    %c0_i32_0 = arith.constant 0 : i32
    %c0_i32_1 = arith.constant 0 : i32
    return %c0_i32, %c0_i32_0 : i32, i32
  }
  func.func @transform_6(%arg0: i32, %arg1: i32) -> (i32, i32) {
    %c0_i32 = arith.constant 0 : i32
    %c0_i32_0 = arith.constant 0 : i32
    %c0_i32_1 = arith.constant 0 : i32
    return %c0_i32, %c0_i32_0 : i32, i32
  }
  func.func @transform_7(%arg0: i32, %arg1: i32) -> (i32, i32, i32) {
    %c0_i32 = arith.constant 0 : i32
    %c0_i32_0 = arith.constant 0 : i32
    return %arg0, %arg1, %c0_i32 : i32, i32, i32
  }
}

</mosaic_0001>

<bundles_post_ra>
// kernel: tpu_custom_call.1
= control target key start
LH: loop header
LB: loop body
LE: loop exit
PB: predicated region body
PF: predicated region fallthrough
CT: control target
= control target key end

     0   :  { %s1540_s0 = inlined_call_operand.hbm [shape: bf16[2,8,32], index: 0, kind: input, shape index: {}]   ;;  %s1541_s1 = inlined_call_operand.hbm [shape: bf16[32,32], index: 1, kind: input, shape index: {}]   ;;  %s1542_s2 = inlined_call_operand.vmem [shape: f32[1,32], index: 2, kind: input, shape index: {}]   ;;  %s1543_s3 = inlined_call_operand.hbm [shape: bf16[32,64], index: 3, kind: input, shape index: {}]   ;;  %s1544_s4 = inlined_call_operand.vmem [shape: f32[1,64], index: 4, kind: input, shape index: {}]   ;;  %s1545_s5 = inlined_call_operand.hbm [shape: bf16[32,32], index: 5, kind: input, shape index: {}]   ;;  %s1546_s6 = inlined_call_operand.vmem [shape: f32[1,32], index: 6, kind: input, shape index: {}]   ;;  %s1547_s7 = inlined_call_operand.hbm [shape: f32[2,8,32], index: 7, kind: output, shape index: {}]  }
   0x1   :  { %1548 = sst [smem:[#allocation17_spill]] %s1541_s1 }
   0x2   :  { %1549 = sst [smem:[#allocation18_spill]] %s1543_s3 }
   0x3   :  { %12 = vsyncpa [#allocation5], 0 }
   0x4   :  { %14 = vsyncpa [#allocation5 + $0x1], 0 }
   0x5   :  { %15 = vsyncpa [#allocation8], 0 }
   0x6   :  { %16 = vsyncpa [#allocation11], 0 }
   0x7   :  { %17 = vsyncpa [#allocation6], 0 }
   0x8   :  { %19 = vsyncpa [#allocation6 + $0x1], 0  ;;  %s1331_s24 = smov 0   ;;  %s1333_s25 = smov 0  }
   0x9   :  { %s1335_s26 = smov 0   ;;  %s1337_s27 = smov 0  }
   0xa   :  { %s1339_s28 = smov 0   ;;  %s1341_s29 = smov 0  }
   0xb LB: > { %s880_s30 = sadd.s32 4294967295, %s1274_s29   ;;  %p882_p0 = scmp.ge.s32.totalorder %s1274_s29, 1  ;;  %s1274_s29 = sphi %s1341_s29, %s25_s29   ;;  %s1270_s28 = sphi %s1339_s28, %s1563_s28   ;;  %s1266_s27 = sphi %s1337_s27, %s1562_s27   ;;  %s1262_s26 = sphi %s1335_s26, %s1561_s26   ;;  %s1258_s25 = sphi %s1333_s25, %s1560_s25   ;;  %s1254_s24 = sphi %s1331_s24, %s1559_s24  }
   0xc   : > { %p1365_p1 = scmp.eq.s32.totalorder %s880_s30, 0  ;;  %p222_p2 = scmp.lt.s32.totalorder %s1274_s29, 3 }
   0xd   : > { %s1551_s1 = sld [smem:[#allocation17_spill]]  ;;  %s1276_s13 = smov [#allocation7]  }
   0xe   : > { %p1373_p3 = pnand %p882_p0, %p222_p2  ;;  %s235_s14 = sshll.u32 %s1276_s13, 4  ;;  %s236_s14 = int_to_ptr.vmem [resolvable:$true] %s235_s14 }
   0xf   : > { %p886_p6 = scmp.ge.s32.totalorder %s1274_s29, 2  ;;  %s1554_s3 = sld [smem:[#allocation18_spill]] }
  0x10   : > { %p956_p4 = pneg %p1373_p3  ;;  %s1277_s19 = smov 64  }
  0x11   : > { %s1278_s20 = smov 4   ;;  %s1279_s21 = smov [#allocation9]  }
  0x12   : > { %p1381_p5 = pnand %p956_p4, %p1365_p1  ;;  %s252_s22 = sshll.u32 %s1279_s21, 4  ;;  %s253_s22 = int_to_ptr.vmem [resolvable:$true] %s252_s22 }
  0x13   : > { %s233_s11 = sshll.u32 %s1551_s1, 4  ;;  %s267_s10 = sshll.u32 %s1545_s5, 4  ;;  %s234_s11 = int_to_ptr.hbm [resolvable:$true] %s233_s11  ;;  %s268_s10 = int_to_ptr.hbm [resolvable:$true] %s267_s10 }
  0x14   : > { %959 = dma.hbm_to_vmem [thread:$0]  (!%p1381_p5), %s234_s11, 256, %s236_s14, [#allocation8], %s1277_s19, %s1277_s19, %s1278_s20  }
  0x15   : > { %s250_s18 = sshll.u32 %s1554_s3, 4  ;;  %s1280_s13 = smov [#allocation10]   ;;  %s251_s18 = int_to_ptr.hbm [resolvable:$true] %s250_s18 }
  0x16   : > { %962 = dma.hbm_to_vmem [thread:$0]  (!%p1381_p5), %s251_s18, 256, %s253_s22, [#allocation8], %s1277_s19, %s1277_s19, %s1278_s20  }
  0x17   : > { %s269_s16 = sshll.u32 %s1280_s13, 4  ;;  %s881_s11 = sadd.s32 4294967294, %s1274_s29   ;;  %s270_s16 = int_to_ptr.vmem [resolvable:$true] %s269_s16 }
  0x18   : > { %965 = dma.hbm_to_vmem [thread:$0]  (!%p1381_p5), %s268_s10, 256, %s270_s16, [#allocation11], %s1277_s19, %s1277_s19, %s1278_s20  }
  0x19   : > { %s37_s14 = sadd.s32 1, %s1270_s28  ;;  %s44_s17 = sadd.s32 1, %s1262_s26 }
  0x1a   : > { %p39_p7 = scmp.ge.s32.totalorder %s37_s14, 2  ;;  %p51_p8 = scmp.ne.s32.totalorder %s1262_s26, %s1258_s25 }
  0x1b   : > { %p52_p9 = scmp.eq.s32.totalorder %s1274_s29, 0  ;;  %p57_p10 = scmp.ne.s32.totalorder %s1258_s25, %s1254_s24 }
  0x1c   : > { %s1565_s14 = smov (%p39_p7, %s37_s14), 0  ;;  %p209_p13 = scmp.eq.s32.totalorder %s880_s30, 1 }
  0x1d   : > { %p1408_p11 = por %p52_p9, %p51_p8  ;;  %p1414_p12 = por %p1365_p1, %p57_p10 }
  0x1e   : > { %s41_s19 = ssub.s32 %s1270_s28, %s1565_s14  ;;  %p215_p2 = scmp.eq.s32.totalorder %s881_s11, 1 }
  0x1f   : > { %p42_p0 = scmp.eq.s32.totalorder %s41_s19, 0  ;;  %p1422_p4 = por %p209_p13, %p51_p8 }
  0x20   : > { %p977_p5 = scmp.lt.s32.totalorder %s1274_s29, 2  ;;  %p1430_p7 = por %p215_p2, %p57_p10 }
  0x21   : > { %s1428_s21 = scalar_select %p42_p0, %s1262_s26, %s44_s17  }
  0x22   : > { %s286_s23 = sand.u32 1, %s1262_s26   ;;  %s888_s10 = sshll.u32 %s1270_s28, 2 }
  0x23   : > { %s887_s9 = sshll.u32 %s286_s23, 2  ;;  %s294_s30 = scalar_lea.hbm %s1540_s0, %s888_s10 }
  0x24   : > { %s290_s19 = scalar_lea.vmem [#allocation4], %s887_s9  ;;  %s296_s1 = sshll.u32 %s294_s30, 4  ;;  %s297_s1 = int_to_ptr.hbm [resolvable:$true] %s296_s1 }
  0x25   : > { %s298_s11 = sshll.u32 %s290_s19, 4  ;;  %p967_p8 = pnand %p977_p5, %p1408_p11  ;;  %s299_s11 = int_to_ptr.vmem [resolvable:$true] %s298_s11 }
  0x26   : > { %s287_s17 = scalar_lea.sflag [#allocation5], %s286_s23  ;;  %307 = sbr.rel (%p1373_p3) target bundleno = 1155 (0x483), region = 48 }
  0x27   : > { %969 = dma.hbm_to_vmem [thread:$0]  (!%p967_p8), %s297_s1, 64, %s299_s11, %s287_s17  }
  0x28   : > { %s1444_s3 = sand.u32 (!%p1373_p3), 1, %s1258_s25  }
  0x29   : > { %s890_s13 = sshll.u32 (!%p1373_p3), %s1444_s3, 2  ;;  %s310_s10 = scalar_lea.sflag (!%p1373_p3), [#allocation5], %s1444_s3 }
  0x2a   : > { %s313_s9 = scalar_lea.vmem (!%p1373_p3), [#allocation4], %s890_s13 }
  0x2b   : > { %1237 = dma.done.wait (%p1414_p12), %s310_s10, 64  }
  0x2c   : > { %1239 = vsyncadd (%p1414_p12), %s310_s10, 4294967232 }
  0x2d   : > { %1241 = dma.done.wait (%p1365_p1), [#allocation8], 512  }
  0x2e   : > { %1243 = vsyncadd (%p1365_p1), [#allocation8], 4294966784 }
  0x2f   : > { %1245 = dma.done.wait (%p1365_p1), [#allocation11], 256  }
  0x30   : > { %1247 = vsyncadd (%p1365_p1), [#allocation11], 4294967040  ;;  %v935_v0 = vld [vmem:[#allocation9 + $0x8] sm:$0xff]  ;;  %v937_v1 = vld [vmem:[#allocation7 + $0x8] sm:$0xff]  ;;  %vm386_vm0 = vcmask 261120   ;;  %vm404_vm1 = vcmask 519168  }
  0x31   : > { %396 = vmatpush.bf16.msra.mxu0 %v935_v0  ;;  %v934_v2 = vld [vmem:[#allocation9] sm:$0xff]  ;;  %442 = vmatpush.bf16.msra.mxu1 %v937_v1  ;;  %v936_v3 = vld [vmem:[#allocation7] sm:$0xff]  ;;  %v365_v4 = vld [vmem:[%s313_s9] sm:$0xf]  ;;  %vm451_vm2 = vcmask 64512   ;;  %s1281_s15 = smov 112  }
  0x32   : > { %v411_v5 = vld [vmem:[%s313_s9] sm:$0xf]  ;;  %v1045_v6 = vld [vmem:[%s1544_s4] ss:$0 sm:$0xff]  ;;  %s1282_s23 = smov 120   ;;  %s1283_s16 = smov 104  }
  0x33   : > { %v1046_v11 = vld [vmem:[%s1542_s2] ss:$0 sm:$0xff]  ;;  %s1284_s30 = smov 96   ;;  %s1285_s19 = smov 88   ;;  %vm489_vm3 = vcmask 1043456   ;;  %vm509_vm4 = vcmask 60416  }
  0x34   : > { %s1286_s11 = smov 80   ;;  %s1287_s17 = smov 72   ;;  %vm579_vm5 = vcmask 126016   ;;  %vm646_vm6 = vcmask 191616   ;;  %vm713_vm7 = vcmask 257216  }
  0x35   : > { %397 = vmatpush.bf16.msra.mxu0 %v934_v2  ;;  %443 = vmatpush.bf16.msra.mxu1 %v936_v3  ;;  %s1288_s13 = smov 16   ;;  %s1289_s10 = smov 8  }
  0x36   : > { %s1290_s9 = smov 24   ;;  %s931_s1 = sshll.u32 %s1266_s27, 3 }
  0x37   : > { %s894_s12 = sshll.u32 %s1444_s3, 3  ;;  %s754_s27 = scalar_lea.sflag [#allocation6], %s1444_s3 }
  0x38   : > { %903 = vmatmul.msk.bf16.vlgmr.msra.gmra.mxu0 %vm386_vm0, %v365_v4  ;;  %912 = vmatmul.msk.bf16.vlgmr.msra.gmra.mxu1 %vm386_vm0, %v411_v5 }
  0xb5   : > { %v399_v7 = vpop.f32.mrf.mxu0  ;;  %v445_v9 = vpop.f32.mrf.mxu1 }
  0xb6   : > { %v400_v8 = vadd.f32 %v1045_v6, %v399_v7  ;;  %v446_v13 = vadd.f32 %v1046_v11, %v445_v9 }
  0xb8   : > { %v403_v10 = vpack.c.bf16 %v400_v8, %v400_v8  ;;  %v449_v18 = vpack.c.bf16 %v446_v13, %v446_v13 }
  0xba   : > { %405 = vst.msk [vmem:[#allocation2] sm:$0xf] %vm404_vm1, %v403_v10  ;;  %v513_v25 = vunpack.c.l.b16 %v449_v18 }
  0xbc   : > { %v514_v27 = vpack.c.b16 %v513_v25, %v513_v25 }
  0xbd   : > { %v401_v12 = vpop.f32.mrf.mxu0  ;;  %v447_v14 = vpop.f32.mrf.mxu1 }
  0xc1   : > { %v450_v15 = vld [vmem:[#allocation2] sm:$0xf] }
  0xc2   : > { %v581_v16 = vld [vmem:[#allocation2] sm:$0xf]  ;;  %v456_v19 = vsel %vm451_vm2, %v450_v15, 0  ;;  %v482_v37 = vunpack.c.l.b16 %v450_v15 }
  0xc3   : > { %v511_v17 = vld [vmem:[#allocation2] sm:$0xf]  ;;  %v585_v20 = vunpack.c.l.b16 %v581_v16  ;;  %465 = vmatpush.bf16.xpose.msra.mxu2 %v456_v19 }
  0xc4   : > { %v518_v21 = vunpack.c.l.b16 %v511_v17  ;;  %v648_v24 = vld [vmem:[#allocation2] sm:$0xf]  ;;  %v483_v38 = vpack.c.b16 %v482_v37, %v482_v37 }
  0xc5   : > { %v586_v22 = vpack.c.b16 %v585_v20, %v585_v20  ;;  %v652_v26 = vunpack.c.l.b16 %v648_v24 }
  0xc6   : > { %v519_v23 = vpack.c.b16 %v518_v21, %v518_v21 }
  0xc7   : > { %587 = vrot.lane.b32.xlu2 %v586_v22, %s1281_s15  ;;  %v1470_v28 = vpack.c.b16 %v652_v26, %v652_v26 }
  0xc8   : > { %520 = vrot.lane.b32.xlu1 %v519_v23, %s1282_s23 }
  0xca   : > { %913 = vmatmul.msk.bf16.vlgmr.msra.gmra.mxu2 %vm451_vm2, %v449_v18 }
  0xcf   : > { %654 = vrot.lane.b32.xlu2 %v1470_v28, %s1283_s16 }
  0xd0   : > { %515 = vrot.lane.b32.xlu1 %v514_v27, %s1282_s23 }
  0xd7   : > { %649 = vrot.lane.b32.xlu2 %v514_v27, %s1283_s16 }
  0xd8   : > { %582 = vrot.lane.b32.xlu1 %v514_v27, %s1281_s15  ;;  %s765_s15 = scalar_lea.hbm %s1547_s7, %s931_s1  ;;  %s1204_s1 = scalar_lea.hbm %s1547_s7, 16 }
 0x121   : > { %v588_v29 = vpop.permute.xlu2 %587 }
 0x122   : > { %v593_v30 = vsel %vm451_vm2, %v588_v29, 0 }
 0x123   : > { %602 = vmatpush.bf16.xpose.msrb.mxu1 %v593_v30 }
 0x129   : > { %v655_v48 = vpop.permute.xlu2 %654 }
 0x12a   : > { %v660_v51 = vsel %vm451_vm2, %v655_v48, 0 }
 0x131   : > { %v650_v54 = vpop.permute.xlu2 %649 }
 0x13a   : > { %v521_v31 = vpop.permute.xlu1 %520 }
 0x13b   : > { %v526_v49 = vsel %vm451_vm2, %v521_v31, 0 }
 0x142   : > { %v516_v32 = vpop.permute.xlu1 %515 }
 0x14a   : > { %v583_v33 = vpop.permute.xlu1 %582 }
 0x14b   : > { %917 = vmatmul.msk.bf16.vlgmr.msrb.gmra.mxu1 %vm451_vm2, %v583_v33 }
 0x14d   : > { %v467_v34 = vpop.f32.mrf.mxu2 }
 0x14e   : > { %v471_v35 = vsel %vm451_vm2, %v467_v34, -inf }
 0x14f   : > { %472 = vmax.xlane.f32.xlu0 %v471_v35 }
 0x155   : > { %v469_v36 = vpop.f32.mrf.mxu2 }
 0x163   : > { %484 = vrot.lane.b32.xlu0 %v483_v38, %s1284_s30  ;;  %s359_s30 = scalar_lea.vmem [#allocation12], %s894_s12 }
 0x16b   : > { %551 = vrot.lane.b32.xlu0 %v519_v23, %s1285_s19  ;;  %s767_s19 = sshll.u32 %s359_s30, 4  ;;  %s768_s19 = int_to_ptr.vmem [resolvable:$true] %s767_s19 }
 0x1c2   : > { %v473_v39 = vpop.xlane.xlu0 %472 }
 0x1c3   : > { %v474_v41 = vsub.f32 %v467_v34, %v473_v39 }
 0x1c5   : > { %v475_v43 = vmul.f32 1.442695, %v474_v41 }
 0x1c7   : > { %1048 = vpow2.f32 %v475_v43 }
 0x1c8   : > { %v604_v40 = vpop.f32.mrf.mxu1 }
 0x1c9   : > { %v608_v42 = vsel %vm451_vm2, %v604_v40, -inf }
 0x1ca   : > { %609 = vmax.xlane.f32.xlu2 %v608_v42 }
 0x1cd   : > { %v1049_v45 = vpop.eup %1048 }
 0x1ce   : > { %v480_v50 = vpack.c.bf16 %v1049_v45, %v1049_v45  ;;  %v477_v7 = vsel %vm451_vm2, %v1049_v45, 0.0  ;;  %v938_v45 = vld [vmem:[#allocation10] sm:$0xff] }
 0x1d0   : > { %v606_v44 = vpop.f32.mrf.mxu1 }
 0x1d1   : > { %v939_v44 = vld [vmem:[#allocation10 + $0x8] sm:$0xff] }
 0x1d2   : > { %745 = vmatpush.bf16.msra.mxu1 %v939_v44 }
 0x1d5   : > { %v485_v46 = vpop.permute.xlu0 %484 }
 0x1d6   : > { %v491_v47 = vsel %vm489_vm3, %v485_v46, 0  ;;  %746 = vmatpush.bf16.msra.mxu1 %v938_v45 }
 0x1d7   : > { %500 = vmatpush.bf16.msra.mxu3 %v491_v47 }
 0x1da   : > { %914 = vmatmul.msk.bf16.vlgmr.msra.gmra.mxu3 %vm451_vm2, %v480_v50  ;;  %v1047_v50 = vld [vmem:[%s1546_s6] ss:$0 sm:$0xff] }
 0x1db   : > { %535 = vmatpush.bf16.xpose.msrb.mxu3 %v526_v49 }
 0x1dd   : > { %v552_v52 = vpop.permute.xlu0 %551 }
 0x1de   : > { %v557_v53 = vsel %vm489_vm3, %v552_v52, 0 }
 0x1df   : > { %566 = vmatpush.bf16.msrb.mxu0 %v557_v53 }
 0x1e2   : > { %618 = vrot.lane.b32.xlu2 %v586_v22, %s1286_s11  ;;  %s769_s11 = sshll.u32 %s765_s15, 4  ;;  %s770_s11 = int_to_ptr.hbm [resolvable:$true] %s769_s11 }
 0x1e3   : > { %669 = vmatpush.bf16.xpose.msra.mxu3 %v660_v51 }
 0x1ea   : > { %915 = vmatmul.msk.bf16.vlgmr.msrb.gmra.mxu3 %vm451_vm2, %v516_v32 }
 0x1fa   : > { %919 = vmatmul.msk.bf16.vlgmr.msra.gmra.mxu3 %vm451_vm2, %v650_v54 }
 0x23d   : > { %v610_v55 = vpop.xlane.xlu2 %609 }
 0x23e   : > { %v611_v56 = vsub.f32 %v604_v40, %v610_v55 }
 0x240   : > { %v612_v57 = vmul.f32 1.442695, %v611_v56 }
 0x242   : > { %1050 = vpow2.f32 %v612_v57 }
 0x245   : > { %v619_v58 = vpop.permute.xlu2 %618 }
 0x246   : > { %v624_v59 = vsel %vm489_vm3, %v619_v58, 0 }
 0x247   : > { %633 = vmatpush.bf16.msrb.mxu2 %v624_v59 }
 0x248   : > { %v1051_v60 = vpop.eup %1050 }
 0x249   : > { %v617_v61 = vpack.c.bf16 %v1051_v60, %v1051_v60  ;;  %v614_v6 = vsel %vm451_vm2, %v1051_v60, 0.0 }
 0x24b   : > { %918 = vmatmul.msk.bf16.vlgmr.msrb.gmra.mxu2 %vm451_vm2, %v617_v61 }
 0x25d   : > { %v502_v62 = vpop.f32.mrf.mxu3 }
 0x265   : > { %v504_v63 = vpop.f32.mrf.mxu3 }
 0x26d   : > { %v537_v0 = vpop.f32.mrf.mxu3 }
 0x26e   : > { %v541_v1 = vsel %vm451_vm2, %v537_v0, -inf }
 0x26f   : > { %542 = vmax.xlane.f32.xlu1 %v541_v1 }
 0x275   : > { %v539_v2 = vpop.f32.mrf.mxu3 }
 0x27d   : > { %v671_v3 = vpop.f32.mrf.mxu3 }
 0x27e   : > { %v675_v4 = vsel %vm451_vm2, %v671_v3, -inf }
 0x27f   : > { %676 = vmax.xlane.f32.xlu0 %v675_v4 }
 0x285   : > { %v673_v5 = vpop.f32.mrf.mxu3 }
 0x287   : > { %615 = vadd.xlane.f32.xlu0 %v614_v6 }
 0x288   : > { %685 = vrot.lane.b32.xlu1 %v1470_v28, %s1287_s17  ;;  %s1198_s17 = sshra.s32 %s770_s11, 4  ;;  %s1199_s17 = int_to_ptr.hbm [resolvable:$true] %s1198_s17 }
 0x289   : > { %p1205_p10 = scmp.lt.s32.totalorder %s1199_s17, %s1547_s7 }
 0x2b2   : > { %478 = vadd.xlane.f32.xlu1 %v477_v7 }
 0x2ce   : > { %v635_v8 = vpop.f32.mrf.mxu2 }
 0x2d6   : > { %v637_v9 = vpop.f32.mrf.mxu2 }
 0x2e2   : > { %v543_v10 = vpop.xlane.xlu1 %542 }
 0x2e3   : > { %v544_v11 = vsub.f32 %v537_v0, %v543_v10 }
 0x2e5   : > { %v545_v12 = vmul.f32 1.442695, %v544_v11 }
 0x2e7   : > { %1052 = vpow2.f32 %v545_v12 }
 0x2ed   : > { %v1053_v13 = vpop.eup %1052 }
 0x2ee   : > { %v547_v14 = vsel %vm451_vm2, %v1053_v13, 0.0  ;;  %v550_v15 = vpack.c.bf16 %v1053_v13, %v1053_v13 }
 0x2ef   : > { %548 = vadd.xlane.f32.xlu0 %v547_v14 }
 0x2f0   : > { %916 = vmatmul.msk.bf16.vlgmr.msrb.gmra.mxu0 %vm451_vm2, %v550_v15 }
 0x2f2   : > { %v677_v16 = vpop.xlane.xlu0 %676 }
 0x2f3   : > { %v678_v17 = vsub.f32 %v671_v3, %v677_v16 }
 0x2f5   : > { %v679_v18 = vmul.f32 1.442695, %v678_v17 }
 0x2f7   : > { %1054 = vpow2.f32 %v679_v18 }
 0x2fa   : > { %v686_v19 = vpop.permute.xlu1 %685  ;;  %v616_v20 = vpop.xlane.xlu0 %615 }
 0x2fb   : > { %v691_v21 = vsel %vm489_vm3, %v686_v19, 0  ;;  %1056 = vrcp.f32 %v616_v20 }
 0x2fc   : > { %700 = vmatpush.bf16.msra.mxu0 %v691_v21 }
 0x2fd   : > { %v1055_v22 = vpop.eup %1054 }
 0x2fe   : > { %v684_v23 = vpack.c.bf16 %v1055_v22, %v1055_v22  ;;  %v681_v24 = vsel %vm451_vm2, %v1055_v22, 0.0 }
 0x2ff   : > { %682 = vadd.xlane.f32.xlu2 %v681_v24 }
 0x300   : > { %920 = vmatmul.msk.bf16.vlgmr.msra.gmra.mxu0 %vm451_vm2, %v684_v23 }
 0x301   : > { %v1057_v25 = vpop.eup %1056 }
 0x302   : > { %v640_v26 = vmul.f32 %v1057_v25, %v635_v8 }
 0x304   : > { %v641_v27 = vpack.c.bf16 %v640_v26, %v640_v26 }
 0x306   : > { %643 = vrot.lane.b32.xlu0 %v641_v27, %s1288_s13  ;;  %s1200_s13 = scalar_lea.hbm %s1199_s17, 8 }
 0x307   : > { %p1201_p1 = scmp.ne.s32.totalorder %s1199_s17, %s1200_s13  ;;  %p1206_p11 = scmp.lt.s32.totalorder %s1204_s1, %s1200_s13 }
 0x309   : > { %p1202_p3 = pnand %p1201_p1, %p1422_p4  ;;  %p1207_p12 = por %p1206_p11, %p1205_p10 }
 0x30b   : > { %p1203_p9 = pneg %p1202_p3 }
 0x30d   : > { %p1208_p13 = pnand %p1207_p12, %p1203_p9 }
 0x325   : > { %v479_v28 = vpop.xlane.xlu1 %478 }
 0x326   : > { %1058 = vrcp.f32 %v479_v28 }
 0x32c   : > { %v1059_v29 = vpop.eup %1058 }
 0x32d   : > { %v507_v30 = vmul.f32 %v1059_v29, %v502_v62 }
 0x32f   : > { %v508_v31 = vpack.c.bf16 %v507_v30, %v507_v30 }
 0x331   : > { %510 = vst.msk [vmem:[#allocation3] sm:$0xf] %vm509_vm4, %v508_v31 }
 0x362   : > { %v549_v32 = vpop.xlane.xlu0 %548 }
 0x363   : > { %1060 = vrcp.f32 %v549_v32 }
 0x369   : > { %v1061_v33 = vpop.eup %1060 }
 0x36d   : > { %v568_v34 = vpop.f32.mrf.mxu0 }
 0x36e   : > { %v573_v35 = vmul.f32 %v1061_v33, %v568_v34 }
 0x370   : > { %v574_v36 = vpack.c.bf16 %v573_v35, %v573_v35 }
 0x372   : > { %576 = vrot.lane.b32.xlu0 %v574_v36, %s1289_s10  ;;  %v683_v37 = vpop.xlane.xlu2 %682 }
 0x373   : > { %1062 = vrcp.f32 %v683_v37 }
 0x375   : > { %v570_v38 = vpop.f32.mrf.mxu0 }
 0x378   : > { %v644_v46 = vpop.permute.xlu0 %643 }
 0x379   : > { %v1063_v39 = vpop.eup %1062 }
 0x37d   : > { %v702_v40 = vpop.f32.mrf.mxu0 }
 0x37e   : > { %v707_v41 = vmul.f32 %v1063_v39, %v702_v40 }
 0x380   : > { %v708_v42 = vpack.c.bf16 %v707_v41, %v707_v41 }
 0x382   : > { %710 = vrot.lane.b32.xlu0 %v708_v42, %s1290_s9 }
 0x385   : > { %v704_v43 = vpop.f32.mrf.mxu0 }
 0x3e4   : > { %v577_v47 = vpop.permute.xlu0 %576 }
 0x3e5   : > { %580 = vst.msk [vmem:[#allocation3] sm:$0xf] %vm579_vm5, %v577_v47 }
 0x3e6   : > { %647 = vst.msk [vmem:[#allocation3] sm:$0xf] %vm646_vm6, %v644_v46 }
 0x3f4   : > { %v711_v48 = vpop.permute.xlu0 %710 }
 0x3f5   : > { %714 = vst.msk [vmem:[#allocation3] sm:$0xf] %vm713_vm7, %v711_v48 }
 0x3fc   : > { %v715_v49 = vld [vmem:[#allocation3] sm:$0xf] }
 0x3fd   : > { %929 = vmatmul.msk.bf16.vlgmr.msra.gmra.mxu1 %vm386_vm0, %v715_v49 }
 0x47a   : > { %v748_v51 = vpop.f32.mrf.mxu1 }
 0x47b   : > { %v749_v52 = vadd.f32 %v1047_v50, %v748_v51 }
 0x47d   : > { %752 = vst.msk [vmem:[%s359_s30] sm:$0xff] %vm386_vm0, %v749_v52 }
 0x47e   : > { %1211 = shalt.err (!%p1208_p13)
}
 0x47f   : > { %954 = dma.vmem_to_hbm [thread:$0]  (%p1422_p4), %s768_s19, 128, %s770_s11, %s754_s27  }
 0x482   : > { %v750_v53 = vpop.f32.mrf.mxu1 }
 0x483 PF: > { %s781_s3 = sand.u32 1, %s1254_s24   ;;  %p971_p0 = pnand %p886_p6, %p1430_p7 }
 0x484   : > { %s782_s18 = scalar_lea.sflag [#allocation6], %s781_s3 }
 0x485   : > { %p972_p2 = pneg %p971_p0 }
 0x487   : > { %1249 = dma.done.wait (%p972_p2), %s782_s18, 128  }
 0x488   : > { %1251 = vsyncadd (%p972_p2), %s782_s18, 4294967168  ;;  %s25_s29 = sadd.s32 1, %s1274_s29   ;;  %s1559_s24 = smov %s1258_s25 }
 0x489   : > { %p22_p5 = scmp.ge.s32.totalorder %s25_s29, 4   ;;  %s1560_s25 = smov %s1262_s26 }
 0x48a   : > { %s1561_s26 = smov %s1428_s21  ;;  %s1562_s27 = smov %s1270_s28 }
 0x48b   : > { %s1563_s28 = smov %s1565_s14  ;;  %24 = sbr.rel (!%p22_p5) target bundleno = 11 (0xb), region = 110 }
 0x490   :  { %788 = vsyncpa [#allocation5], 1 }
 0x491   :  { %790 = vsyncpa [#allocation5 + $0x1], 1 }
 0x492   :  { %791 = vsyncpa [#allocation8], 1 }
 0x493   :  { %792 = vsyncpa [#allocation11], 1 }
 0x494   :  { %793 = vsyncpa [#allocation6], 1 }
 0x495   :  { %795 = vsyncpa [#allocation6 + $0x1], 1 }

</bundles_post_ra>
